<compile_context>
chip_gen: v5e
topology: v5e:2x2
jax: 0.10.0
libtpu: 0.0.40
codegen_flags: <defaults>
</compile_context>

<pallas_src>
import jax
import jax.numpy as jnp
from jax.experimental import pallas as pl
from jax.experimental.pallas import tpu as pltpu


_ROW_ALIGN = 16   # covers f32 (8) and bf16 (16) sublane packing
_LANE = 128       # lane width / MXU minor dim


def _round_up(v, m):
    return ((v + m - 1) // m) * m


def _cdiv(a, b):
    return -(-a // b)


def _vmem_budget():
    """Generation-aware scoped-VMEM (budget, limit) in bytes, with safe fallback."""
    cap = None
    try:
        cap = int(pltpu.get_tpu_info().vmem_capacity_bytes)
    except Exception:
        cap = None
    if not cap or cap <= 0:
        cap = 64 * 1024 * 1024  # conservative (v7x-sized) fallback
    limit = min(cap * 3 // 4, cap - 16 * 1024 * 1024)   # 128MiB->96MiB, 64MiB->48MiB
    limit = max(limit, 32 * 1024 * 1024)
    budget = max(limit - 8 * 1024 * 1024, 24 * 1024 * 1024)
    return budget, limit


def _num_tensorcores():
    """Best-effort detection of 2-TC parts (v7x); default to 1 TC."""
    try:
        kind = jax.devices()[0].device_kind.lower()
    except Exception:
        return 1
    return 2 if "v7" in kind else 1


def _choose_tm(M, E_pad, h_width, x_itemsize, mxu_itemsize, budget,
               resident_weights, num_tc, requested):
    """Pick a row tile that fits the VMEM budget (or honor a caller override)."""
    if requested is not None:
        tm = _round_up(max(int(requested), _ROW_ALIGN), _ROW_ALIGN)
    else:
        if resident_weights:
            # weights resident once via Buffered(1) + f32 fused biases
            static = 2 * E_pad * h_width * mxu_itemsize + (h_width + E_pad) * 4
        else:
            # double-buffered (E_pad,tH) + (tH,E_pad) weight tiles + bias tiles
            static = 4 * E_pad * h_width * mxu_itemsize + 2 * (h_width + E_pad) * 4
        per_row = (4 * E_pad * x_itemsize                   # double-buffered in/out tiles
                   + (3 * E_pad + 2 * h_width) * 4          # f32 temporaries (x, xhat, y, h)
                   + (E_pad + h_width) * mxu_itemsize)      # MXU-dtype operand copies
        if not resident_weights:
            per_row += E_pad * 4 + E_pad * mxu_itemsize     # f32 acc + xhat scratch
        avail = max(budget - static, per_row * _ROW_ALIGN)
        tm = max(_ROW_ALIGN, (avail // per_row) // _ROW_ALIGN * _ROW_ALIGN)
        tm = min(tm, 512)                                   # amortization saturates ~512 rows
    tm = min(tm, _round_up(M, _ROW_ALIGN))
    if num_tc >= 2 and M > 4 * _ROW_ALIGN:
        # 2-TC parts: target >= 2 tiles per core so the x/out DMAs pipeline on each core
        tm = min(tm, _round_up(_cdiv(M, 2 * num_tc), _ROW_ALIGN))
    return max(tm, _ROW_ALIGN)


def _make_resident_kernel(e_true, e_pad, mxu_dtype):
    """All weights resident in VMEM; single grid axis over row tiles."""
    need_mask = e_pad != e_true
    inv_e = 1.0 / float(e_true)

    def kernel(x_ref, w1_ref, b1_ref, alpha_ref, w2_ref, b2_ref, o_ref):
        x = x_ref[...].astype(jnp.float32)
        # LayerNorm stats over the true E (padded lanes are zero; eps = 1e-5).
        mean = jnp.sum(x, axis=-1, keepdims=True) * inv_e
        xc = x - mean
        if need_mask:
            lane = jax.lax.broadcasted_iota(jnp.int32, x.shape, 1)
            xc = jnp.where(lane < e_true, xc, 0.0)
        var = jnp.sum(xc * xc, axis=-1, keepdims=True) * inv_e
        xhat = xc * jax.lax.rsqrt(var + 1e-5)
        # Linear(E -> H): MXU operands in the weight dtype, f32 accumulation.
        h = jnp.dot(xhat.astype(mxu_dtype), w1_ref[...],
                    preferred_element_type=jnp.float32)
        h = h + b1_ref[...]                           # fused (beta @ w1 + b1), f32
        alpha = alpha_ref[0]                          # scalar PReLU slope from SMEM
        h = jnp.where(h >= 0.0, h, alpha * h)
        # (Dropout -> identity in eval mode.)
        y = jnp.dot(h.astype(mxu_dtype), w2_ref[...],
                    preferred_element_type=jnp.float32)
        y = y + b2_ref[...]
        # Re-read x for the residual: keeps the f32 x live range short across the GEMMs.
        o_ref[...] = (y + x_ref[...].astype(jnp.float32)).astype(o_ref.dtype)

    return kernel


def _make_htiled_kernel(e_true, e_pad, mxu_dtype):
    """H-tiled path: LN cached once per row tile, partial y accumulated in f32 scratch."""
    need_mask = e_pad != e_true
    inv_e = 1.0 / float(e_true)

    def kernel(x_ref, w1_ref, b1_ref, alpha_ref, w2_ref, b2_ref, o_ref,
               xhat_ref, acc_ref):
        hi = pl.program_id(1)

        @pl.when(hi == 0)
        def _():
            x = x_ref[...].astype(jnp.float32)
            mean = jnp.sum(x, axis=-1, keepdims=True) * inv_e
            xc = x - mean
            if need_mask:
                lane = jax.lax.broadcasted_iota(jnp.int32, x.shape, 1)
                xc = jnp.where(lane < e_true, xc, 0.0)
            var = jnp.sum(xc * xc, axis=-1, keepdims=True) * inv_e
            xhat_ref[...] = (xc * jax.lax.rsqrt(var + 1e-5)).astype(xhat_ref.dtype)
            acc_ref[...] = jnp.zeros_like(acc_ref)

        h = jnp.dot(xhat_ref[...], w1_ref[...], preferred_element_type=jnp.float32)
        h = h + b1_ref[...]
        alpha = alpha_ref[0]
        h = jnp.where(h >= 0.0, h, alpha * h)
        acc_ref[...] += jnp.dot(h.astype(mxu_dtype), w2_ref[...],
                                preferred_element_type=jnp.float32)

        @pl.when(hi == pl.num_programs(1) - 1)
        def _():
            y = acc_ref[...] + b2_ref[...] + x_ref[...].astype(jnp.float32)
            o_ref[...] = y.astype(o_ref.dtype)

    return kernel


def mlp_block(x, gamma, beta, w1, b1, alpha, w2, b2, *,
              tm=None, h_tile=None, mxu_dtype=None):
    """MLPblock forward.

    x: (B, S, E); gamma/beta: (E,) LayerNorm affine; w1: (E, H); b1: (H,);
    alpha: scalar PReLU slope; w2: (H, E); b2: (E,).
    tm: optional row-tile override; h_tile: force the H-tiled path with this tile;
    mxu_dtype: matmul operand dtype (defaults to the weight dtype -> bf16 weights
    run the MXU in bf16 with f32 accumulation).
    """
    B, S, E = x.shape
    H = w1.shape[1]
    M = B * S

    mxu_dtype = jnp.dtype(w1.dtype if mxu_dtype is None else mxu_dtype)
    mxu_itemsize = mxu_dtype.itemsize

    # --- Fold LayerNorm affine into the first Linear (once, f32, highest precision). ---
    gamma_f = gamma.astype(jnp.float32)
    beta_f = beta.astype(jnp.float32)
    w1_f = w1.astype(jnp.float32)
    w1_eff = gamma_f[:, None] * w1_f                                        # (E, H) f32
    b1_eff = (jnp.dot(beta_f, w1_f, precision=jax.lax.Precision.HIGHEST)
              + b1.astype(jnp.float32))                                     # (H,) f32
    b2_f = b2.astype(jnp.float32)

    # --- Lane-dense padding of E / H to multiples of 128 (zeros are exact). ---
    E_pad = _round_up(E, _LANE)
    H_pad0 = _round_up(H, _LANE)

    budget, vmem_limit = _vmem_budget()
    num_tc = _num_tensorcores()

    weight_bytes = 2 * E_pad * H_pad0 * mxu_itemsize
    if h_tile is not None:
        tH = _round_up(int(h_tile), _LANE)
        nh = _cdiv(H, tH)
        H_pad = tH * nh
        resident = False
    elif weight_bytes <= budget // 3:
        resident = True
        H_pad = H_pad0
        tH = H_pad
        nh = 1
    else:
        resident = False
        align = 256 if H_pad0 % 256 == 0 else _LANE
        # Largest tH (multiple of align) whose double-buffered weight tiles stay
        # under ~half the budget; then split H into equal tiles with minimal padding.
        tH_max = max(align, ((budget // 2) // (4 * E_pad * mxu_itemsize)) // align * align)
        nh = max(1, _cdiv(H_pad0, tH_max))
        tH = _round_up(_cdiv(H_pad0, nh), align)
        H_pad = tH * nh

    # --- Pad / cast parameters (zero padding keeps the padded math exact). ---
    w1_p = jnp.pad(w1_eff, ((0, E_pad - E), (0, H_pad - H))).astype(mxu_dtype)
    w2_p = jnp.pad(w2, ((0, H_pad - H), (0, E_pad - E))).astype(mxu_dtype)
    b1_p = jnp.pad(b1_eff, (0, H_pad - H)).reshape(1, H_pad)                # f32
    b2_p = jnp.pad(b2_f, (0, E_pad - E)).reshape(1, E_pad)                  # f32
    alpha_smem = jnp.asarray(alpha, jnp.float32).reshape(1)                 # SMEM scalar

    tm = _choose_tm(M, E_pad, H_pad if resident else tH, x.dtype.itemsize,
                    mxu_itemsize, budget, resident, num_tc, tm)
    m_pad = _round_up(M, tm)

    x2d = x.reshape(M, E)
    if m_pad != M or E_pad != E:
        # Padded rows/lanes are zero; LN of a zero row stays finite (var+eps) and
        # padded output lanes/rows are sliced off after the call.
        x2d = jnp.pad(x2d, ((0, m_pad - M), (0, E_pad - E)))

    flops = 4 * m_pad * E_pad * H_pad                      # two GEMMs
    bytes_accessed = (x2d.size * x2d.dtype.itemsize
                      + m_pad * E_pad * x.dtype.itemsize
                      + (w1_p.size + w2_p.size) * mxu_itemsize
                      + (b1_p.size + b2_p.size) * 4)
    cost = pl.CostEstimate(flops=int(flops), transcendentals=int(m_pad),
                           bytes_accessed=int(bytes_accessed))

    if resident:
        const = lambda i: (0, 0)   # revisited params: same block every step, no re-DMA
        grid = (m_pad // tm,)
        in_specs = [
            pl.BlockSpec((tm, E_pad), lambda i: (i, 0)),                    # x row tile
            pl.BlockSpec((E_pad, H_pad), const, pipeline_mode=pl.Buffered(1)),  # w1 (LN-folded)
            pl.BlockSpec((1, H_pad), const, pipeline_mode=pl.Buffered(1)),      # b1 fused, f32
            pl.BlockSpec(memory_space=pltpu.MemorySpace.SMEM),              # PReLU alpha
            pl.BlockSpec((H_pad, E_pad), const, pipeline_mode=pl.Buffered(1)),  # w2
            pl.BlockSpec((1, E_pad), const, pipeline_mode=pl.Buffered(1)),      # b2, f32
        ]
        out_specs = pl.BlockSpec((tm, E_pad), lambda i: (i, 0))
        scratch_shapes = []
        dims = ("parallel",)
        kernel = _make_resident_kernel(E, E_pad, mxu_dtype)
    else:
        grid = (m_pad // tm, nh)
        in_specs = [
            pl.BlockSpec((tm, E_pad), lambda i, hi: (i, 0)),                # x (revisited over hi)
            pl.BlockSpec((E_pad, tH), lambda i, hi: (0, hi)),               # w1 H-tile
            pl.BlockSpec((1, tH), lambda i, hi: (0, hi)),                   # b1 H-tile, f32
            pl.BlockSpec(memory_space=pltpu.MemorySpace.SMEM),              # PReLU alpha
            pl.BlockSpec((tH, E_pad), lambda i, hi: (hi, 0)),               # w2 H-tile
            pl.BlockSpec((1, E_pad), lambda i, hi: (0, 0)),                 # b2, f32
        ]
        out_specs = pl.BlockSpec((tm, E_pad), lambda i, hi: (i, 0))
        scratch_shapes = [pltpu.VMEM((tm, E_pad), mxu_dtype),               # cached LN result
                          pltpu.VMEM((tm, E_pad), jnp.float32)]             # f32 y accumulator
        dims = ("parallel", "arbitrary")
        kernel = _make_htiled_kernel(E, E_pad, mxu_dtype)

    out2d = pl.pallas_call(
        kernel,
        out_shape=jax.ShapeDtypeStruct((m_pad, E_pad), x.dtype),
        grid_spec=pltpu.PrefetchScalarGridSpec(
            num_scalar_prefetch=0,
            grid=grid,
            in_specs=in_specs,
            out_specs=out_specs,
            scratch_shapes=scratch_shapes,
        ),
        compiler_params=pltpu.CompilerParams(
            dimension_semantics=dims,
            vmem_limit_bytes=vmem_limit,
        ),
        cost_estimate=cost,
    )(x2d, w1_p, b1_p, alpha_smem, w2_p, b2_p)

    return out2d[:M, :E].reshape(B, S, E)


def reference(x, gamma, beta, w1, b1, alpha, w2, b2):
    """Faithful (unfused) forward matching the PyTorch module (eval mode)."""
    xf = x.astype(jnp.float32)
    mean = jnp.mean(xf, axis=-1, keepdims=True)
    var = jnp.mean((xf - mean) ** 2, axis=-1, keepdims=True)
    ln = (xf - mean) * jax.lax.rsqrt(var + 1e-5) * gamma.astype(jnp.float32) + beta.astype(jnp.float32)
    h = ln @ w1.astype(jnp.float32) + b1.astype(jnp.float32)
    h = jnp.where(h >= 0.0, h, alpha * h)
    y = h @ w2.astype(jnp.float32) + b2.astype(jnp.float32)
    return (y + xf).astype(jnp.float32)


if __name__ == "__main__":
    key = jax.random.PRNGKey(0)
    kx, kw1, kb1, kw2, kb2, kw1b, kb1b, kw2b = jax.random.split(key, 8)

    B, S, E, H = 2, 8, 32, 64
    x = jax.random.normal(kx, (B, S, E), dtype=jnp.float32)
    # Power-of-two gamma scales: exact under folding (and under bf16 re-rounding),
    # so the strict kernel-vs-reference comparisons don't depend on fold rounding.
    gamma = (2.0 ** ((jnp.arange(E) % 3) - 1)).astype(jnp.float32)
    beta = jnp.zeros((E,), jnp.float32)
    w1 = jax.random.normal(kw1, (E, H), jnp.float32) * (1.0 / jnp.sqrt(E))
    b1 = jax.random.normal(kb1, (H,), jnp.float32) * 0.01
    alpha = 0.25                                  # PReLU default init
    w2 = jax.random.normal(kw2, (H, E), jnp.float32) * (1.0 / jnp.sqrt(H))
    b2 = jax.random.normal(kb2, (E,), jnp.float32) * 0.01

    # --- 1) Resident-weights path, f32, strict check. ---
    out = jax.block_until_ready(mlp_block(x, gamma, beta, w1, b1, alpha, w2, b2))
    ref = reference(x, gamma, beta, w1, b1, alpha, w2, b2)
    assert out.shape == (B, S, E)
    assert jnp.allclose(out, ref.astype(out.dtype), atol=2e-4, rtol=2e-4), "resident f32 mismatch"

    # --- 2) H-tiled accumulation path (forced via h_tile), f32, strict check. ---
    H2 = 256
    w1b = jax.random.normal(kw1b, (E, H2), jnp.float32) * (1.0 / jnp.sqrt(E))
    b1b = jax.random.normal(kb1b, (H2,), jnp.float32) * 0.01
    w2b = jax.random.normal(kw2b, (H2, E), jnp.float32) * (1.0 / jnp.sqrt(H2))
    out2 = jax.block_until_ready(
        mlp_block(x, gamma, beta, w1b, b1b, alpha, w2b, b2, h_tile=128))
    ref2 = reference(x, gamma, beta, w1b, b1b, alpha, w2b, b2)
    assert jnp.allclose(out2, ref2.astype(out2.dtype), atol=2e-4, rtol=2e-4), "H-tiled f32 mismatch"

    # --- 3) bf16 weights/activations -> bf16 MXU operands, loose check. ---
    xb = x.astype(jnp.bfloat16)
    out3 = jax.block_until_ready(
        mlp_block(xb, gamma, beta, w1.astype(jnp.bfloat16), b1, alpha,
                  w2.astype(jnp.bfloat16), b2))
    ref3 = reference(xb.astype(jnp.float32), gamma, beta,
                     w1.astype(jnp.bfloat16), b1, alpha,
                     w2.astype(jnp.bfloat16), b2)
    assert jnp.allclose(out3.astype(jnp.float32), ref3, atol=1e-1, rtol=5e-2), "bf16 mismatch"

    print("KERNEL_OK")
</pallas_src>

<mosaic_0001>
module attributes {stable_mosaic.version = 11 : i64} {
  func.func @kernel(%arg0: i32, %arg1: memref<16x128xf32, #tpu.memory_space<vmem>>, %arg2: memref<128x128xf32, #tpu.memory_space<vmem>>, %arg3: memref<1x128xf32, #tpu.memory_space<vmem>>, %arg4: memref<1xf32, #tpu.memory_space<smem>>, %arg5: memref<128x128xf32, #tpu.memory_space<vmem>>, %arg6: memref<1x128xf32, #tpu.memory_space<vmem>>, %arg7: memref<16x128xf32, #tpu.memory_space<vmem>>) attributes {dimension_semantics = [#tpu.dimension_semantics<parallel>], iteration_bounds = array<i64: 1>, scalar_prefetch = 0 : i64, scratch_operands = 0 : i64, tpu.core_type = #tpu.core_type<tc>, window_params = [{transform_indices = @transform_0, window_bounds = array<i64: 16, 128>}, {pipeline_mode = #tpu.pipeline_mode<synchronous>, transform_indices = @transform_1, window_bounds = array<i64: 128, 128>}, {pipeline_mode = #tpu.pipeline_mode<synchronous>, transform_indices = @transform_2, window_bounds = array<i64: 1, 128>}, {transform_indices = @transform_3, window_bounds = array<i64: 1>}, {pipeline_mode = #tpu.pipeline_mode<synchronous>, transform_indices = @transform_4, window_bounds = array<i64: 128, 128>}, {pipeline_mode = #tpu.pipeline_mode<synchronous>, transform_indices = @transform_5, window_bounds = array<i64: 1, 128>}, {transform_indices = @transform_6, window_bounds = array<i64: 16, 128>}]} {
    %c0 = arith.constant 0 : index
    %c0_0 = arith.constant 0 : index
    %0 = vector.load %arg1[%c0, %c0_0] : memref<16x128xf32, #tpu.memory_space<vmem>>, vector<16x128xf32>
    %cst = arith.constant dense<0.000000e+00> : vector<16xf32>
    %1 = vector.multi_reduction <add>, %0, %cst [1] : vector<16x128xf32> to vector<16xf32>
    %2 = vector.shape_cast %1 : vector<16xf32> to vector<16x1xf32>
    %cst_1 = arith.constant 3.125000e-02 : f32
    %3 = vector.broadcast %cst_1 : f32 to vector<16x1xf32>
    %4 = arith.mulf %2, %3 : vector<16x1xf32>
    %5 = vector.broadcast %4 : vector<16x1xf32> to vector<16x128xf32>
    %6 = arith.subf %0, %5 : vector<16x128xf32>
    %7 = tpu.iota {dimensions = array<i32: 1>} : vector<16x128xi32>
    %c32_i32 = arith.constant 32 : i32
    %8 = vector.broadcast %c32_i32 : i32 to vector<16x128xi32>
    %9 = arith.cmpi slt, %7, %8 : vector<16x128xi32>
    %cst_2 = arith.constant 0.000000e+00 : f32
    %10 = vector.broadcast %cst_2 : f32 to vector<16x128xf32>
    %11 = arith.select %9, %6, %10 : vector<16x128xi1>, vector<16x128xf32>
    %12 = arith.mulf %11, %11 : vector<16x128xf32>
    %cst_3 = arith.constant dense<0.000000e+00> : vector<16xf32>
    %13 = vector.multi_reduction <add>, %12, %cst_3 [1] : vector<16x128xf32> to vector<16xf32>
    %14 = vector.shape_cast %13 : vector<16xf32> to vector<16x1xf32>
    %cst_4 = arith.constant 3.125000e-02 : f32
    %15 = vector.broadcast %cst_4 : f32 to vector<16x1xf32>
    %16 = arith.mulf %14, %15 : vector<16x1xf32>
    %cst_5 = arith.constant 9.99999974E-6 : f32
    %17 = vector.broadcast %cst_5 : f32 to vector<16x1xf32>
    %18 = arith.addf %16, %17 : vector<16x1xf32>
    %19 = math.rsqrt %18 : vector<16x1xf32>
    %20 = vector.broadcast %19 : vector<16x1xf32> to vector<16x128xf32>
    %21 = arith.mulf %11, %20 : vector<16x128xf32>
    %c0_6 = arith.constant 0 : index
    %c0_7 = arith.constant 0 : index
    %22 = vector.load %arg2[%c0_6, %c0_7] : memref<128x128xf32, #tpu.memory_space<vmem>>, vector<128x128xf32>
    %cst_8 = arith.constant dense<0.000000e+00> : vector<16x128xf32>
    %23 = tpu.matmul %21, %22, %cst_8 {dimension_numbers = #tpu.dot_dimension_numbers<[1], [0], [0], [1], [0, 0, 1, 1], [], []>} : vector<16x128xf32>, vector<128x128xf32>, vector<16x128xf32> -> vector<16x128xf32>
    %c0_9 = arith.constant 0 : index
    %c0_10 = arith.constant 0 : index
    %24 = vector.load %arg3[%c0_9, %c0_10] : memref<1x128xf32, #tpu.memory_space<vmem>>, vector<1x128xf32>
    %25 = vector.broadcast %24 : vector<1x128xf32> to vector<16x128xf32>
    %26 = arith.addf %23, %25 : vector<16x128xf32>
    %c0_11 = arith.constant 0 : index
    %27 = memref.load %arg4[%c0_11] : memref<1xf32, #tpu.memory_space<smem>>
    %cst_12 = arith.constant 0.000000e+00 : f32
    %28 = vector.broadcast %cst_12 : f32 to vector<16x128xf32>
    %29 = arith.cmpf oge, %26, %28 : vector<16x128xf32>
    %30 = vector.broadcast %27 : f32 to vector<16x128xf32>
    %31 = arith.mulf %30, %26 : vector<16x128xf32>
    %32 = arith.select %29, %26, %31 : vector<16x128xi1>, vector<16x128xf32>
    %c0_13 = arith.constant 0 : index
    %c0_14 = arith.constant 0 : index
    %33 = vector.load %arg5[%c0_13, %c0_14] : memref<128x128xf32, #tpu.memory_space<vmem>>, vector<128x128xf32>
    %cst_15 = arith.constant dense<0.000000e+00> : vector<16x128xf32>
    %34 = tpu.matmul %32, %33, %cst_15 {dimension_numbers = #tpu.dot_dimension_numbers<[1], [0], [0], [1], [0, 0, 1, 1], [], []>} : vector<16x128xf32>, vector<128x128xf32>, vector<16x128xf32> -> vector<16x128xf32>
    %c0_16 = arith.constant 0 : index
    %c0_17 = arith.constant 0 : index
    %35 = vector.load %arg6[%c0_16, %c0_17] : memref<1x128xf32, #tpu.memory_space<vmem>>, vector<1x128xf32>
    %36 = vector.broadcast %35 : vector<1x128xf32> to vector<16x128xf32>
    %37 = arith.addf %34, %36 : vector<16x128xf32>
    %c0_18 = arith.constant 0 : index
    %c0_19 = arith.constant 0 : index
    %38 = vector.load %arg1[%c0_18, %c0_19] : memref<16x128xf32, #tpu.memory_space<vmem>>, vector<16x128xf32>
    %39 = arith.addf %37, %38 : vector<16x128xf32>
    %c0_20 = arith.constant 0 : index
    %c0_21 = arith.constant 0 : index
    %40 = vector.load %arg7[%c0_20, %c0_21] : memref<16x128xf32, #tpu.memory_space<vmem>>, vector<16x128xf32>
    tpu.vector_store %arg7[%c0_20, %c0_21], %39 {strides = array<i32>} : memref<16x128xf32, #tpu.memory_space<vmem>>, vector<16x128xf32>,
    return
  }
  func.func @transform_0(%arg0: i32) -> (i32, i32) {
    %c0_i32 = arith.constant 0 : i32
    %c0_i32_0 = arith.constant 0 : i32
    return %arg0, %c0_i32 : i32, i32
  }
  func.func @transform_1(%arg0: i32) -> (i32, i32) {
    %c0_i32 = arith.constant 0 : i32
    %c0_i32_0 = arith.constant 0 : i32
    %c0_i32_1 = arith.constant 0 : i32
    return %c0_i32, %c0_i32_0 : i32, i32
  }
  func.func @transform_2(%arg0: i32) -> (i32, i32) {
    %c0_i32 = arith.constant 0 : i32
    %c0_i32_0 = arith.constant 0 : i32
    %c0_i32_1 = arith.constant 0 : i32
    return %c0_i32, %c0_i32_0 : i32, i32
  }
  func.func @transform_3(%arg0: i32) -> i32 {
    %c0_i32 = arith.constant 0 : i32
    %c0_i32_0 = arith.constant 0 : i32
    return %c0_i32 : i32
  }
  func.func @transform_4(%arg0: i32) -> (i32, i32) {
    %c0_i32 = arith.constant 0 : i32
    %c0_i32_0 = arith.constant 0 : i32
    %c0_i32_1 = arith.constant 0 : i32
    return %c0_i32, %c0_i32_0 : i32, i32
  }
  func.func @transform_5(%arg0: i32) -> (i32, i32) {
    %c0_i32 = arith.constant 0 : i32
    %c0_i32_0 = arith.constant 0 : i32
    %c0_i32_1 = arith.constant 0 : i32
    return %c0_i32, %c0_i32_0 : i32, i32
  }
  func.func @transform_6(%arg0: i32) -> (i32, i32) {
    %c0_i32 = arith.constant 0 : i32
    %c0_i32_0 = arith.constant 0 : i32
    return %arg0, %c0_i32 : i32, i32
  }
}

</mosaic_0001>

<bundles_post_ra>
// kernel: tpu_custom_call.1
= control target key start
LH: loop header
LB: loop body
LE: loop exit
PB: predicated region body
PF: predicated region fallthrough
CT: control target
= control target key end

     0   :  { %12 = vsyncpa [#allocation4], 0  ;;  %s477_s0 = inlined_call_operand.hbm [shape: f32[16,128], index: 0, kind: input, shape index: {}]   ;;  %s478_s1 = inlined_call_operand.hbm [shape: f32[128,128], index: 1, kind: input, shape index: {}]   ;;  %s479_s2 = inlined_call_operand.vmem [shape: f32[1,128], index: 2, kind: input, shape index: {}]   ;;  %s480_s3 = inlined_call_operand.<no memory space> [shape: f32[1], index: 3, kind: input, shape index: {}]   ;;  %s481_s4 = inlined_call_operand.hbm [shape: f32[128,128], index: 4, kind: input, shape index: {}]   ;;  %s482_s5 = inlined_call_operand.vmem [shape: f32[1,128], index: 5, kind: input, shape index: {}]   ;;  %s483_s6 = inlined_call_operand.hbm [shape: f32[16,128], index: 6, kind: output, shape index: {}]  }
   0x1   :  { %13 = vsyncpa [#allocation7], 0 }
   0x2   :  { %14 = vsyncpa [#allocation5], 0  ;;  %s32_s23 = sshll.u32 %s478_s1, 4  ;;  %s383_s24 = smov [#allocation6]   ;;  %s33_s23 = int_to_ptr.hbm [resolvable:$true] %s32_s23 }
   0x3   :  { %s34_s25 = sshll.u32 %s383_s24, 4  ;;  %s19_s28 = sshll.u32 %s477_s0, 4  ;;  %s35_s25 = int_to_ptr.vmem [resolvable:$true] %s34_s25  ;;  %s20_s28 = int_to_ptr.hbm [resolvable:$true] %s19_s28 }
   0x4   :  { %s384_s29 = smov 128   ;;  %s385_s30 = smov 8  }
   0x5   :  { %40 = dma.hbm_to_vmem [thread:$0]  %s33_s23, 2048, %s35_s25, [#allocation7], %s384_s29, %s384_s29, %s385_s30  }
   0x6   :  { %s386_s7 = smov [#allocation3]   ;;  %s49_s1 = sshll.u32 %s481_s4, 4  ;;  %s50_s1 = int_to_ptr.hbm [resolvable:$true] %s49_s1 }
   0x7   :  { %s21_s8 = sshll.u32 %s386_s7, 4  ;;  %s387_s0 = smov [#allocation8]   ;;  %s22_s8 = int_to_ptr.vmem [resolvable:$true] %s21_s8 }
   0x8   :  { %27 = dma.hbm_to_vmem [thread:$0]  %s20_s28, 256, %s22_s8, [#allocation4], %s384_s29, %s384_s29, %s385_s30  }
   0x9   :  { %s51_s11 = sshll.u32 %s387_s0, 4  ;;  %s52_s11 = int_to_ptr.vmem [resolvable:$true] %s51_s11 }
   0xa   :  { %57 = dma.hbm_to_vmem [thread:$0]  %s50_s1, 2048, %s52_s11, [#allocation7], %s384_s29, %s384_s29, %s385_s30  }
   0xb   :  { %377 = dma.done.wait [#allocation4], 256  }
   0xc   :  { %378 = vsyncadd [#allocation4], 4294967040 }
   0xd   :  { %379 = dma.done.wait [#allocation7], 4096  }
   0xe   :  { %380 = vsyncadd [#allocation7], 4294963200  ;;  %v442_v0 = vld [vmem:[#allocation3 + $0x8] sm:$0xff]  ;;  %v445_v1 = vld [vmem:[#allocation3] sm:$0xff]  ;;  %v82_v6 = vlaneseq  ;;  %s223_s19 = sshll.u32 %s483_s6, 4  ;;  %s224_s19 = int_to_ptr.hbm [resolvable:$true] %s223_s19 }
   0xf   :  { %76 = vadd.xlane.f32.xlu0 %v442_v0  ;;  %v134_v2 = vld [vmem:[#allocation6 + $0x78] sm:$0xff]  ;;  %v133_v3 = vld [vmem:[#allocation6 + $0x70] sm:$0xff]  ;;  %v132_v4 = vld [vmem:[#allocation6 + $0x68] sm:$0xff] }
  0x10   :  { %237 = vmatpush.msra.mxu2 %v134_v2  ;;  %139 = vmatpush.msra.mxu0 %v134_v2  ;;  %v131_v5 = vld [vmem:[#allocation6 + $0x60] sm:$0xff]  ;;  %v83_v7 = vand.u32 127, %v82_v6  ;;  %v130_v18 = vld [vmem:[#allocation6 + $0x58] sm:$0xff]  ;;  %v129_v19 = vld [vmem:[#allocation6 + $0x50] sm:$0xff] }
  0x11   :  { %v128_v20 = vld [vmem:[#allocation6 + $0x48] sm:$0xff]  ;;  %v127_v21 = vld [vmem:[#allocation6 + $0x40] sm:$0xff]  ;;  %v126_v22 = vld [vmem:[#allocation6 + $0x38] sm:$0xff] }
  0x12   :  { %238 = vmatpush.msra.mxu2 %v133_v3  ;;  %140 = vmatpush.msra.mxu0 %v133_v3  ;;  %vm84_vm0 = vcmp.lt.s32.totalorder %v83_v7, 32  ;;  %v125_v23 = vld [vmem:[#allocation6 + $0x30] sm:$0xff]  ;;  %v124_v24 = vld [vmem:[#allocation6 + $0x28] sm:$0xff]  ;;  %v123_v25 = vld [vmem:[#allocation6 + $0x20] sm:$0xff] }
  0x13   :  { %v122_v26 = vld [vmem:[#allocation6 + $0x18] sm:$0xff]  ;;  %v121_v27 = vld [vmem:[#allocation6 + $0x10] sm:$0xff]  ;;  %v120_v28 = vld [vmem:[#allocation6 + $0x8] sm:$0xff] }
  0x14   :  { %239 = vmatpush.msra.mxu2 %v132_v4  ;;  %141 = vmatpush.msra.mxu0 %v132_v4  ;;  %v119_v29 = vld [vmem:[#allocation6] sm:$0xff]  ;;  %v185_v32 = vld [vmem:[#allocation8 + $0x78] sm:$0xff]  ;;  %v184_v33 = vld [vmem:[#allocation8 + $0x70] sm:$0xff] }
  0x15   :  { %253 = vmatpush.msra.mxu3 %v185_v32  ;;  %190 = vmatpush.msra.mxu1 %v185_v32  ;;  %v183_v35 = vld [vmem:[#allocation8 + $0x68] sm:$0xff]  ;;  %v182_v36 = vld [vmem:[#allocation8 + $0x60] sm:$0xff]  ;;  %v181_v37 = vld [vmem:[#allocation8 + $0x58] sm:$0xff] }
  0x16   :  { %240 = vmatpush.msra.mxu2 %v131_v5  ;;  %142 = vmatpush.msra.mxu0 %v131_v5  ;;  %v180_v40 = vld [vmem:[#allocation8 + $0x50] sm:$0xff]  ;;  %v179_v43 = vld [vmem:[#allocation8 + $0x48] sm:$0xff]  ;;  %v178_v45 = vld [vmem:[#allocation8 + $0x40] sm:$0xff] }
  0x17   :  { %74 = vadd.xlane.f32.xlu0 %v445_v1  ;;  %254 = vmatpush.msra.mxu3 %v184_v33  ;;  %v177_v47 = vld [vmem:[#allocation8 + $0x38] sm:$0xff]  ;;  %v176_v49 = vld [vmem:[#allocation8 + $0x30] sm:$0xff]  ;;  %v175_v52 = vld [vmem:[#allocation8 + $0x28] sm:$0xff] }
  0x18   :  { %241 = vmatpush.msra.mxu2 %v130_v18  ;;  %143 = vmatpush.msra.mxu0 %v130_v18  ;;  %v174_v55 = vld [vmem:[#allocation8 + $0x20] sm:$0xff]  ;;  %v173_v59 = vld [vmem:[#allocation8 + $0x18] sm:$0xff]  ;;  %v172_v3 = vld [vmem:[#allocation8 + $0x10] sm:$0xff] }
  0x19   :  { %191 = vmatpush.msra.mxu1 %v184_v33  ;;  %255 = vmatpush.msra.mxu3 %v183_v35  ;;  %v171_v4 = vld [vmem:[#allocation8 + $0x8] sm:$0xff]  ;;  %v170_v5 = vld [vmem:[#allocation8] sm:$0xff]  ;;  %v275_v6 = vld [vmem:[%s479_s2] ss:$0 sm:$0xff]  ;;  %s388_s2 = smov [#allocation9]  }
  0x1a   :  { %242 = vmatpush.msra.mxu2 %v129_v19  ;;  %144 = vmatpush.msra.mxu0 %v129_v19 }
  0x1b   :  { %192 = vmatpush.msra.mxu1 %v183_v35  ;;  %256 = vmatpush.msra.mxu3 %v182_v36 }
  0x1c   :  { %243 = vmatpush.msra.mxu2 %v128_v20  ;;  %145 = vmatpush.msra.mxu0 %v128_v20 }
  0x1d   :  { %193 = vmatpush.msra.mxu1 %v182_v36  ;;  %257 = vmatpush.msra.mxu3 %v181_v37 }
  0x1e   :  { %244 = vmatpush.msra.mxu2 %v127_v21  ;;  %146 = vmatpush.msra.mxu0 %v127_v21 }
  0x1f   :  { %194 = vmatpush.msra.mxu1 %v181_v37  ;;  %258 = vmatpush.msra.mxu3 %v180_v40 }
  0x20   :  { %245 = vmatpush.msra.mxu2 %v126_v22  ;;  %147 = vmatpush.msra.mxu0 %v126_v22 }
  0x21   :  { %195 = vmatpush.msra.mxu1 %v180_v40  ;;  %259 = vmatpush.msra.mxu3 %v179_v43 }
  0x22   :  { %246 = vmatpush.msra.mxu2 %v125_v23  ;;  %148 = vmatpush.msra.mxu0 %v125_v23 }
  0x23   :  { %196 = vmatpush.msra.mxu1 %v179_v43  ;;  %260 = vmatpush.msra.mxu3 %v178_v45 }
  0x24   :  { %247 = vmatpush.msra.mxu2 %v124_v24  ;;  %149 = vmatpush.msra.mxu0 %v124_v24 }
  0x25   :  { %197 = vmatpush.msra.mxu1 %v178_v45  ;;  %261 = vmatpush.msra.mxu3 %v177_v47 }
  0x26   :  { %248 = vmatpush.msra.mxu2 %v123_v25  ;;  %150 = vmatpush.msra.mxu0 %v123_v25 }
  0x27   :  { %198 = vmatpush.msra.mxu1 %v177_v47  ;;  %262 = vmatpush.msra.mxu3 %v176_v49 }
  0x28   :  { %249 = vmatpush.msra.mxu2 %v122_v26  ;;  %151 = vmatpush.msra.mxu0 %v122_v26 }
  0x29   :  { %199 = vmatpush.msra.mxu1 %v176_v49  ;;  %263 = vmatpush.msra.mxu3 %v175_v52 }
  0x2a   :  { %250 = vmatpush.msra.mxu2 %v121_v27  ;;  %152 = vmatpush.msra.mxu0 %v121_v27 }
  0x2b   :  { %200 = vmatpush.msra.mxu1 %v175_v52  ;;  %264 = vmatpush.msra.mxu3 %v174_v55 }
  0x2c   :  { %251 = vmatpush.msra.mxu2 %v120_v28  ;;  %153 = vmatpush.msra.mxu0 %v120_v28 }
  0x2d   :  { %201 = vmatpush.msra.mxu1 %v174_v55  ;;  %265 = vmatpush.msra.mxu3 %v173_v59 }
  0x2e   :  { %252 = vmatpush.msra.mxu2 %v119_v29  ;;  %154 = vmatpush.msra.mxu0 %v119_v29 }
  0x2f   :  { %202 = vmatpush.msra.mxu1 %v173_v59  ;;  %266 = vmatpush.msra.mxu3 %v172_v3 }
  0x31   :  { %203 = vmatpush.msra.mxu1 %v172_v3  ;;  %267 = vmatpush.msra.mxu3 %v171_v4 }
  0x33   :  { %204 = vmatpush.msra.mxu1 %v171_v4  ;;  %268 = vmatpush.msra.mxu3 %v170_v5 }
  0x35   :  { %205 = vmatpush.msra.mxu1 %v170_v5 }
  0x82   :  { %v77_v8 = vpop.xlane.xlu0 %76 }
  0x83   :  { %v79_v9 = vmul.f32 0.03125, %v77_v8  ;;  %v165_v8 = vstv %s480_s3  ;;  %s221_s3 = sshll.u32 %s388_s2, 4  ;;  %s222_s3 = int_to_ptr.vmem [resolvable:$true] %s221_s3 }
  0x85   :  { %v81_v10 = vsub.f32 %v442_v0, %v79_v9 }
  0x87   :  { %v449_v11 = vsel %vm84_vm0, %v81_v10, 0.0 }
  0x88   :  { %v88_v12 = vmul.f32 %v449_v11, %v449_v11 }
  0x8a   :  { %91 = vadd.xlane.f32.xlu1 %v88_v12  ;;  %v75_v13 = vpop.xlane.xlu0 %74 }
  0x8b   :  { %v78_v14 = vmul.f32 0.03125, %v75_v13 }
  0x8d   :  { %v80_v15 = vsub.f32 %v445_v1, %v78_v14 }
  0x8f   :  { %v454_v16 = vsel %vm84_vm0, %v80_v15, 0.0 }
  0x90   :  { %v87_v17 = vmul.f32 %v454_v16, %v454_v16 }
  0x92   :  { %89 = vadd.xlane.f32.xlu1 %v87_v17 }
  0xfd   :  { %v92_v30 = vpop.xlane.xlu1 %91 }
  0xfe   :  { %v94_v31 = vmul.f32 0.03125, %v92_v30 }
 0x100   :  { %v96_v34 = vadd.f32 1e-05, %v94_v31 }
 0x102   :  { %277 = vrsqrt.f32 %v96_v34  ;;  %vm113_vm2 = vweird.f32 %v96_v34 }
 0x105   :  { %v90_v38 = vpop.xlane.xlu1 %89 }
 0x106   :  { %v93_v39 = vmul.f32 0.03125, %v90_v38 }
 0x108   :  { %v278_v41 = vpop.eup %277  ;;  %v95_v42 = vadd.f32 1e-05, %v93_v39 }
 0x109   :  { %v108_v44 = vmul.f32 %v278_v41, %v96_v34  ;;  %vm114_vm1 = vweird.f32 %v278_v41 }
 0x10a   :  { %279 = vrsqrt.f32 %v95_v42  ;;  %vm115_vm3 = vmor %vm113_vm2, %vm114_vm1  ;;  %vm103_vm5 = vweird.f32 %v95_v42 }
 0x10b   :  { %v109_v46 = vmul.f32 %v278_v41, %v108_v44 }
 0x10d   :  { %v110_v48 = vmul.f32 0.5, %v109_v46 }
 0x10f   :  { %v111_v50 = vsub.f32 1.5, %v110_v48 }
 0x110   :  { %v280_v51 = vpop.eup %279 }
 0x111   :  { %v98_v53 = vmul.f32 %v280_v51, %v95_v42  ;;  %v112_v54 = vmul.f32 %v278_v41, %v111_v50  ;;  %vm104_vm4 = vweird.f32 %v280_v51 }
 0x112   :  { %vm105_vm6 = vmor %vm103_vm5, %vm104_vm4 }
 0x113   :  { %v99_v56 = vmul.f32 %v280_v51, %v98_v53  ;;  %v116_v57 = vsel %vm115_vm3, %v278_v41, %v112_v54 }
 0x114   :  { %v118_v58 = vmul.f32 %v116_v57, %v449_v11 }
 0x115   :  { %v100_v60 = vmul.f32 0.5, %v99_v56 }
 0x116   :  { %158 = vmatmul.f32.vlgmr.msra.gmra.mxu2 %v118_v58 }
 0x117   :  { %v101_v61 = vsub.f32 1.5, %v100_v60 }
 0x119   :  { %v102_v62 = vmul.f32 %v280_v51, %v101_v61 }
 0x11b   :  { %v106_v63 = vsel %vm105_vm6, %v280_v51, %v102_v62 }
 0x11c   :  { %v117_v2 = vmul.f32 %v106_v63, %v454_v16  ;;  %v276_v16 = vld [vmem:[%s482_s5] ss:$0 sm:$0xff] }
 0x11e   :  { %155 = vmatmul.f32.vlgmr.msra.gmra.mxu0 %v117_v2 }
 0x199   :  { %v159_v7 = vpop.f32.mrf.mxu2 }
 0x19a   :  { %v160_v9 = vadd.f32 %v275_v6, %v159_v7 }
 0x19b   :  { %v156_v10 = vpop.f32.mrf.mxu0 }
 0x19c   :  { %v157_v11 = vadd.f32 %v275_v6, %v156_v10  ;;  %vm164_vm7 = vcmp.ge.f32.partialorder %v160_v9, 0.0  ;;  %v167_v12 = vmul.f32 %v165_v8, %v160_v9 }
 0x19e   :  { %v169_v13 = vsel %vm164_vm7, %v160_v9, %v167_v12  ;;  %vm163_vm8 = vcmp.ge.f32.partialorder %v157_v11, 0.0  ;;  %v166_v14 = vmul.f32 %v165_v8, %v157_v11 }
 0x19f   :  { %209 = vmatmul.f32.vlgmr.msra.gmra.mxu3 %v169_v13 }
 0x1a0   :  { %v168_v15 = vsel %vm163_vm8, %v157_v11, %v166_v14 }
 0x1a1   :  { %206 = vmatmul.f32.vlgmr.msra.gmra.mxu1 %v168_v15 }
 0x21e   :  { %v207_v17 = vpop.f32.mrf.mxu1 }
 0x21f   :  { %v208_v18 = vadd.f32 %v276_v16, %v207_v17 }
 0x221   :  { %v213_v19 = vadd.f32 %v208_v18, %v445_v1 }
 0x222   :  { %v210_v20 = vpop.f32.mrf.mxu3 }
 0x223   :  { %215 = vst [vmem:[#allocation9] sm:$0xff] %v213_v19  ;;  %v211_v21 = vadd.f32 %v276_v16, %v210_v20 }
 0x225   :  { %v214_v22 = vadd.f32 %v211_v21, %v442_v0 }
 0x227   :  { %216 = vst [vmem:[#allocation9 + $0x8] sm:$0xff] %v214_v22 }
 0x228   :  { %229 = dma.vmem_to_hbm [thread:$0]  %s222_s3, 256, %s224_s19, [#allocation5], %s384_s29, %s384_s29, %s385_s30  }
 0x229   :  { %381 = dma.done.wait [#allocation5], 256  }
 0x22a   :  { %382 = vsyncadd [#allocation5], 4294967040 }
 0x22b   :  { %234 = vsyncpa [#allocation4], 1 }
 0x22c   :  { %235 = vsyncpa [#allocation7], 1 }
 0x22d   :  { %236 = vsyncpa [#allocation5], 1 }

</bundles_post_ra>
